<compile_context>
chip_gen: v7x
topology: tpu7x:2x2x1
jax: 0.10.0
libtpu: 0.0.40
codegen_flags: <defaults>
</compile_context>

<pallas_src>
import functools

import jax
import jax.numpy as jnp
from jax.experimental import pallas as pl
from jax.experimental.pallas import tpu as pltpu


# ---------------------------------------------------------------------------
# Kernel
# ---------------------------------------------------------------------------
def mlp_kernel(x_ref, w1_ref, b1_ref, w2_ref, b2_ref, w3_ref, b3_ref, o_ref):
    # Cast the f32 input tile to the matmul dtype (bf16) in-kernel: the HBM read
    # of x stays 4 B/elt and happens exactly once (no wrapper-side cast pass).
    x = x_ref[...].astype(w1_ref.dtype)
    # layer1: bf16 operands on the MXU, f32 accumulation; epilogue in f32
    h1 = jnp.dot(x, w1_ref[...], preferred_element_type=jnp.float32)
    h1 = jnp.maximum(h1 + b1_ref[...], 0.0)
    # layer2
    h2 = jnp.dot(h1.astype(w2_ref.dtype), w2_ref[...],
                 preferred_element_type=jnp.float32)
    h2 = jnp.maximum(h2 + b2_ref[...], 0.0)
    # layer3 (no activation)
    h3 = jnp.dot(h2.astype(w3_ref.dtype), w3_ref[...],
                 preferred_element_type=jnp.float32)
    o_ref[...] = (h3 + b3_ref[...]).astype(o_ref.dtype)


# ---------------------------------------------------------------------------
# Tiling / budget helpers
# ---------------------------------------------------------------------------
_TILE_UNIT = 16          # bf16 sublane packing: 16 rows per packed vreg
_MAX_TILE_B = 512        # large batch tile -> near HBM roofline, amortized overhead


def _round_up(x, m):
    return ((x + m - 1) // m) * m


def _tensorcores_per_chip():
    """1 TC on v5e/v6e; 2 TCs (megacore) on v4/v5p/v7x. Perf-only heuristic."""
    try:
        kind = jax.devices()[0].device_kind.lower()
    except Exception:
        return 1
    if "lite" in kind or "v5e" in kind or "v6e" in kind or "v6 lite" in kind:
        return 1
    if "v7" in kind or "v5p" in kind or "v4" in kind:
        return 2
    return 1


def _pick_tile_b(B, n_cores, max_tile=_MAX_TILE_B):
    """Batch tile: multiple of 16, as large as possible (<= max_tile), one grid
    step on single-core chips, >= n_cores steps on megacore chips, and chosen to
    minimize zero-padding for awkward batch sizes (caller pads)."""
    Bu = _round_up(B, _TILE_UNIT)
    target = min(_round_up(pl.cdiv(Bu, max(1, n_cores)), _TILE_UNIT), max_tile)
    lo = min(target, 128)  # never fragment into tiny tiles
    best_t = target
    best_pad = pl.cdiv(B, target) * target
    for t in range(lo, target + 1, _TILE_UNIT):
        padded = pl.cdiv(B, t) * t
        if padded < best_pad or (padded == best_pad and t > best_t):
            best_t, best_pad = t, padded
    return best_t


def _vmem_limit_bytes(tile_b, in_m, inner_m, out_m, out_itemsize, weight_bufs):
    """Scoped VMEM request sized to the working set (+2x headroom), capped at
    48 MiB so v7x's 64 MiB physical VMEM keeps compiler/scratch headroom."""
    w_bytes = (in_m * inner_m + inner_m * inner_m + inner_m * out_m) * 2 * weight_bufs
    b_bytes = (inner_m + inner_m + out_m) * 4 * weight_bufs
    x_bytes = tile_b * in_m * 4 * 2            # double-buffered f32 input tile
    o_bytes = tile_b * out_m * out_itemsize * 2
    act_bytes = tile_b * (3 * inner_m + out_m) * 4  # in-kernel f32/bf16 intermediates
    working = w_bytes + b_bytes + x_bytes + o_bytes + act_bytes
    return int(min(max(2 * working, 16 << 20), 48 << 20))


# ---------------------------------------------------------------------------
# Parameter prep (done ONCE, not per forward call)
# ---------------------------------------------------------------------------
def prepare_net1_params(w1, b1, w2, b2, w3, b3, compute_dtype=jnp.bfloat16):
    """One-time conversion: weights -> (in, out) bf16 MXU operands, biases ->
    (1, out) f32 for the f32 epilogue. Call at model-load time so the forward
    pass never re-casts weights (no per-call HBM round-trip)."""
    return (w1.astype(compute_dtype), b1.astype(jnp.float32).reshape(1, -1),
            w2.astype(compute_dtype), b2.astype(jnp.float32).reshape(1, -1),
            w3.astype(compute_dtype), b3.astype(jnp.float32).reshape(1, -1))


# ---------------------------------------------------------------------------
# Forward
# ---------------------------------------------------------------------------
def net1_forward(x, params, *, tile_b=None, out_dtype=None):
    """x: (B, inputSize) f32; params from prepare_net1_params().
    Returns (B, inputSize) in out_dtype (default: x.dtype).
    Tip: pass out_dtype=jnp.bfloat16 to halve the largest HBM store if the
    consumer tolerates bf16 activations."""
    w1, b1, w2, b2, w3, b3 = params
    B, in_m = x.shape
    inner_m = w1.shape[1]
    out_m = w3.shape[1]
    if out_dtype is None:
        out_dtype = x.dtype
    out_itemsize = jnp.dtype(out_dtype).itemsize

    n_cores = _tensorcores_per_chip()
    if tile_b is None:
        tile_b = _pick_tile_b(B, n_cores)
    assert tile_b % 8 == 0, "tile_b must be a multiple of 8 (sublane constraint)"

    # Pad awkward batch sizes up to a multiple of tile_b (zero rows, sliced off
    # at the end). No-op for the common divisible case.
    B_pad = pl.cdiv(B, tile_b) * tile_b
    x_in = x if B_pad == B else jnp.pad(x, ((0, B_pad - B), (0, 0)))
    grid = (B_pad // tile_b,)

    # Weights/biases use a constant index_map -> loaded once, VMEM-resident
    # across the grid. Single-buffer them only when double-buffering would
    # actually pressure VMEM (large innerSize), which matters on v7x (64 MiB).
    w_bytes = (in_m * inner_m + inner_m * inner_m + inner_m * out_m) * w1.dtype.itemsize
    single_buffer_weights = (2 * w_bytes) > (8 << 20)
    weight_bufs = 1 if single_buffer_weights else 2

    def full(shape):
        if single_buffer_weights:
            return pl.BlockSpec(shape, lambda i: (0, 0), pipeline_mode=pl.Buffered(1))
        return pl.BlockSpec(shape, lambda i: (0, 0))

    flops = 2 * B_pad * (in_m * inner_m + inner_m * inner_m + inner_m * out_m)
    bytes_accessed = (
        B_pad * in_m * x.dtype.itemsize
        + sum(a.size * a.dtype.itemsize for a in (w1, w2, w3, b1, b2, b3))
        + B_pad * out_m * out_itemsize
    )

    out = pl.pallas_call(
        mlp_kernel,
        out_shape=jax.ShapeDtypeStruct((B_pad, out_m), out_dtype),
        grid_spec=pltpu.PrefetchScalarGridSpec(
            num_scalar_prefetch=0,
            grid=grid,
            in_specs=[
                pl.BlockSpec((tile_b, in_m), lambda i: (i, 0)),   # x tile (f32)
                full((in_m, inner_m)),                            # w1 (bf16)
                full((1, inner_m)),                               # b1 (f32)
                full((inner_m, inner_m)),                         # w2 (bf16)
                full((1, inner_m)),                               # b2 (f32)
                full((inner_m, out_m)),                           # w3 (bf16)
                full((1, out_m)),                                 # b3 (f32)
            ],
            out_specs=pl.BlockSpec((tile_b, out_m), lambda i: (i, 0)),
        ),
        compiler_params=pltpu.CompilerParams(
            dimension_semantics=("parallel",),
            vmem_limit_bytes=_vmem_limit_bytes(
                tile_b, in_m, inner_m, out_m, out_itemsize, weight_bufs),
        ),
        cost_estimate=pl.CostEstimate(
            flops=flops, transcendentals=0, bytes_accessed=bytes_accessed),
    )(x_in, w1, b1, w2, b2, w3, b3)

    return out if B_pad == B else out[:B]


# ---------------------------------------------------------------------------
# Init (PyTorch nn.Linear-style) and test
# ---------------------------------------------------------------------------
def init_linear(key, fan_in, fan_out, dtype=jnp.float32):
    """Deterministic PyTorch-style init: U(-1/sqrt(fan_in), 1/sqrt(fan_in)).
    Returns weight already transposed to (in, out) and bias as (1, out)."""
    kw, kb = jax.random.split(key)
    bound = 1.0 / jnp.sqrt(jnp.float32(fan_in))
    w = jax.random.uniform(kw, (fan_in, fan_out), dtype, -bound, bound)
    b = jax.random.uniform(kb, (1, fan_out), dtype, -bound, bound)
    return w, b


if __name__ == "__main__":
    # Shapes consistent with Net1(inputSize, innerSize); feature dims are
    # multiples of 128 for lane-dense layouts.
    B, input_size, inner_size = 256, 256, 128

    key = jax.random.PRNGKey(0)
    kx, k1, k2, k3 = jax.random.split(key, 4)

    x = jax.random.normal(kx, (B, input_size), jnp.float32)
    w1, b1 = init_linear(k1, input_size, inner_size)
    w2, b2 = init_linear(k2, inner_size, inner_size)
    w3, b3 = init_linear(k3, inner_size, input_size)

    # One-time weight conversion (model-load time), NOT per forward call.
    params = prepare_net1_params(w1, b1, w2, b2, w3, b3)

    fwd = jax.jit(functools.partial(net1_forward, params=params))
    y = jax.block_until_ready(fwd(x))
    assert y.shape == (B, input_size) and y.dtype == x.dtype

    # Reference with the same bf16-operand / f32-accumulation path as the kernel.
    bf = jnp.bfloat16

    def ref_fwd(xx):
        h = jnp.maximum(jnp.dot(xx.astype(bf), w1.astype(bf),
                                preferred_element_type=jnp.float32) + b1, 0.0)
        h = jnp.maximum(jnp.dot(h.astype(bf), w2.astype(bf),
                                preferred_element_type=jnp.float32) + b2, 0.0)
        return jnp.dot(h.astype(bf), w3.astype(bf),
                       preferred_element_type=jnp.float32) + b3

    assert jnp.allclose(y, ref_fwd(x), atol=2e-3, rtol=2e-3)

    # Loose sanity check against the pure-f32 forward (bf16 operand quantization
    # is the only difference; numerics artifact, not a semantics change).
    ref32 = jnp.maximum(x @ w1 + b1, 0.0)
    ref32 = jnp.maximum(ref32 @ w2 + b2, 0.0)
    ref32 = ref32 @ w3 + b3
    assert jnp.allclose(y, ref32, atol=1e-1, rtol=1e-1)

    # Awkward batch size: exercises the hardened tile picker + zero-pad path
    # (previously B=20 could produce an illegal tile_b=10 block).
    x_odd = jax.random.normal(kx, (20, input_size), jnp.float32)
    y_odd = jax.block_until_ready(net1_forward(x_odd, params))
    assert y_odd.shape == (20, input_size)
    assert jnp.allclose(y_odd, ref_fwd(x_odd), atol=2e-3, rtol=2e-3)

    print("KERNEL_OK")
</pallas_src>

<mosaic_0001>
module attributes {stable_mosaic.version = 11 : i64} {
  func.func @mlp_kernel(%arg0: i32, %arg1: memref<256x256xf32, #tpu.memory_space<vmem>>, %arg2: memref<256x128xbf16, #tpu.memory_space<vmem>>, %arg3: memref<1x128xf32, #tpu.memory_space<vmem>>, %arg4: memref<128x128xbf16, #tpu.memory_space<vmem>>, %arg5: memref<1x128xf32, #tpu.memory_space<vmem>>, %arg6: memref<128x256xbf16, #tpu.memory_space<vmem>>, %arg7: memref<1x256xf32, #tpu.memory_space<vmem>>, %arg8: memref<256x256xf32, #tpu.memory_space<vmem>>) attributes {dimension_semantics = [#tpu.dimension_semantics<parallel>], iteration_bounds = array<i64: 1>, scalar_prefetch = 0 : i64, scratch_operands = 0 : i64, tpu.core_type = #tpu.core_type<tc>, window_params = [{transform_indices = @transform_0, window_bounds = array<i64: 256, 256>}, {pipeline_mode = #tpu.pipeline_mode<synchronous>, transform_indices = @transform_1, window_bounds = array<i64: 256, 128>}, {pipeline_mode = #tpu.pipeline_mode<synchronous>, transform_indices = @transform_2, window_bounds = array<i64: 1, 128>}, {pipeline_mode = #tpu.pipeline_mode<synchronous>, transform_indices = @transform_3, window_bounds = array<i64: 128, 128>}, {pipeline_mode = #tpu.pipeline_mode<synchronous>, transform_indices = @transform_4, window_bounds = array<i64: 1, 128>}, {pipeline_mode = #tpu.pipeline_mode<synchronous>, transform_indices = @transform_5, window_bounds = array<i64: 128, 256>}, {pipeline_mode = #tpu.pipeline_mode<synchronous>, transform_indices = @transform_6, window_bounds = array<i64: 1, 256>}, {transform_indices = @transform_7, window_bounds = array<i64: 256, 256>}]} {
    %c0 = arith.constant 0 : index
    %c0_0 = arith.constant 0 : index
    %0 = vector.load %arg1[%c0, %c0_0] : memref<256x256xf32, #tpu.memory_space<vmem>>, vector<256x256xf32>
    %1 = arith.truncf %0 : vector<256x256xf32> to vector<256x256xbf16>
    %c0_1 = arith.constant 0 : index
    %c0_2 = arith.constant 0 : index
    %2 = vector.load %arg2[%c0_1, %c0_2] : memref<256x128xbf16, #tpu.memory_space<vmem>>, vector<256x128xbf16>
    %cst = arith.constant dense<0.000000e+00> : vector<256x128xf32>
    %3 = tpu.matmul %1, %2, %cst {dimension_numbers = #tpu.dot_dimension_numbers<[1], [0], [0], [1], [0, 0, 1, 1], [], []>} : vector<256x256xbf16>, vector<256x128xbf16>, vector<256x128xf32> -> vector<256x128xf32>
    %c0_3 = arith.constant 0 : index
    %c0_4 = arith.constant 0 : index
    %4 = vector.load %arg3[%c0_3, %c0_4] : memref<1x128xf32, #tpu.memory_space<vmem>>, vector<1x128xf32>
    %5 = vector.broadcast %4 : vector<1x128xf32> to vector<256x128xf32>
    %6 = arith.addf %3, %5 : vector<256x128xf32>
    %cst_5 = arith.constant 0.000000e+00 : f32
    %7 = vector.broadcast %cst_5 : f32 to vector<256x128xf32>
    %8 = arith.maximumf %6, %7 : vector<256x128xf32>
    %9 = arith.truncf %8 : vector<256x128xf32> to vector<256x128xbf16>
    %c0_6 = arith.constant 0 : index
    %c0_7 = arith.constant 0 : index
    %10 = vector.load %arg4[%c0_6, %c0_7] : memref<128x128xbf16, #tpu.memory_space<vmem>>, vector<128x128xbf16>
    %cst_8 = arith.constant dense<0.000000e+00> : vector<256x128xf32>
    %11 = tpu.matmul %9, %10, %cst_8 {dimension_numbers = #tpu.dot_dimension_numbers<[1], [0], [0], [1], [0, 0, 1, 1], [], []>} : vector<256x128xbf16>, vector<128x128xbf16>, vector<256x128xf32> -> vector<256x128xf32>
    %c0_9 = arith.constant 0 : index
    %c0_10 = arith.constant 0 : index
    %12 = vector.load %arg5[%c0_9, %c0_10] : memref<1x128xf32, #tpu.memory_space<vmem>>, vector<1x128xf32>
    %13 = vector.broadcast %12 : vector<1x128xf32> to vector<256x128xf32>
    %14 = arith.addf %11, %13 : vector<256x128xf32>
    %cst_11 = arith.constant 0.000000e+00 : f32
    %15 = vector.broadcast %cst_11 : f32 to vector<256x128xf32>
    %16 = arith.maximumf %14, %15 : vector<256x128xf32>
    %17 = arith.truncf %16 : vector<256x128xf32> to vector<256x128xbf16>
    %c0_12 = arith.constant 0 : index
    %c0_13 = arith.constant 0 : index
    %18 = vector.load %arg6[%c0_12, %c0_13] : memref<128x256xbf16, #tpu.memory_space<vmem>>, vector<128x256xbf16>
    %cst_14 = arith.constant dense<0.000000e+00> : vector<256x256xf32>
    %19 = tpu.matmul %17, %18, %cst_14 {dimension_numbers = #tpu.dot_dimension_numbers<[1], [0], [0], [1], [0, 0, 1, 1], [], []>} : vector<256x128xbf16>, vector<128x256xbf16>, vector<256x256xf32> -> vector<256x256xf32>
    %c0_15 = arith.constant 0 : index
    %c0_16 = arith.constant 0 : index
    %20 = vector.load %arg7[%c0_15, %c0_16] : memref<1x256xf32, #tpu.memory_space<vmem>>, vector<1x256xf32>
    %21 = vector.broadcast %20 : vector<1x256xf32> to vector<256x256xf32>
    %22 = arith.addf %19, %21 : vector<256x256xf32>
    %c0_17 = arith.constant 0 : index
    %c0_18 = arith.constant 0 : index
    %23 = vector.load %arg8[%c0_17, %c0_18] : memref<256x256xf32, #tpu.memory_space<vmem>>, vector<256x256xf32>
    tpu.vector_store %arg8[%c0_17, %c0_18], %22 {strides = array<i32>} : memref<256x256xf32, #tpu.memory_space<vmem>>, vector<256x256xf32>,
    return
  }
  func.func @transform_0(%arg0: i32) -> (i32, i32) {
    %c0_i32 = arith.constant 0 : i32
    %c0_i32_0 = arith.constant 0 : i32
    return %arg0, %c0_i32 : i32, i32
  }
  func.func @transform_1(%arg0: i32) -> (i32, i32) {
    %c0_i32 = arith.constant 0 : i32
    %c0_i32_0 = arith.constant 0 : i32
    %c0_i32_1 = arith.constant 0 : i32
    return %c0_i32, %c0_i32_0 : i32, i32
  }
  func.func @transform_2(%arg0: i32) -> (i32, i32) {
    %c0_i32 = arith.constant 0 : i32
    %c0_i32_0 = arith.constant 0 : i32
    %c0_i32_1 = arith.constant 0 : i32
    return %c0_i32, %c0_i32_0 : i32, i32
  }
  func.func @transform_3(%arg0: i32) -> (i32, i32) {
    %c0_i32 = arith.constant 0 : i32
    %c0_i32_0 = arith.constant 0 : i32
    %c0_i32_1 = arith.constant 0 : i32
    return %c0_i32, %c0_i32_0 : i32, i32
  }
  func.func @transform_4(%arg0: i32) -> (i32, i32) {
    %c0_i32 = arith.constant 0 : i32
    %c0_i32_0 = arith.constant 0 : i32
    %c0_i32_1 = arith.constant 0 : i32
    return %c0_i32, %c0_i32_0 : i32, i32
  }
  func.func @transform_5(%arg0: i32) -> (i32, i32) {
    %c0_i32 = arith.constant 0 : i32
    %c0_i32_0 = arith.constant 0 : i32
    %c0_i32_1 = arith.constant 0 : i32
    return %c0_i32, %c0_i32_0 : i32, i32
  }
  func.func @transform_6(%arg0: i32) -> (i32, i32) {
    %c0_i32 = arith.constant 0 : i32
    %c0_i32_0 = arith.constant 0 : i32
    %c0_i32_1 = arith.constant 0 : i32
    return %c0_i32, %c0_i32_0 : i32, i32
  }
  func.func @transform_7(%arg0: i32) -> (i32, i32) {
    %c0_i32 = arith.constant 0 : i32
    %c0_i32_0 = arith.constant 0 : i32
    return %arg0, %c0_i32 : i32, i32
  }
}

</mosaic_0001>

<bundles_post_ra>
// kernel: net1_forward.1
= control target key start
LH: loop header
LB: loop body
LE: loop exit
PB: predicated region body
PF: predicated region fallthrough
CT: control target
= control target key end

     0   :  { %12 = vsyncpa [#allocation3], 0  ;;  %s1843_s0 = inlined_call_operand.hbm [shape: f32[256,256], index: 0, kind: input, shape index: {}]   ;;  %s1844_s1 = inlined_call_operand.vmem [shape: bf16[256,128], index: 1, kind: input, shape index: {}]   ;;  %s1845_s2 = inlined_call_operand.vmem [shape: f32[1,128], index: 2, kind: input, shape index: {}]   ;;  %s1846_s3 = inlined_call_operand.vmem [shape: bf16[128,128], index: 3, kind: input, shape index: {}]   ;;  %s1847_s4 = inlined_call_operand.vmem [shape: f32[1,128], index: 4, kind: input, shape index: {}]   ;;  %s1848_s5 = inlined_call_operand.vmem [shape: bf16[128,256], index: 5, kind: input, shape index: {}]   ;;  %s1849_s6 = inlined_call_operand.vmem [shape: f32[1,256], index: 6, kind: input, shape index: {}]   ;;  %s1850_s7 = inlined_call_operand.hbm [shape: f32[256,256], index: 7, kind: output, shape index: {}]  }
   0x1   :  { %13 = vsyncpa [#allocation4], 0  ;;  %s1487_s24 = smov [#allocation2]   ;;  %s1439_s28 = scalar_lea.hbm %s1843_s0, 8192 }
   0x2   :  { %s19_s25 = sshll.u32 %s1487_s24, 4  ;;  %p1440_p0 = scmp.ne.s32.totalorder %s1843_s0, %s1439_s28  ;;  %s20_s25 = int_to_ptr.vmem [resolvable:$true] %s19_s25 }
   0x3   :  { %p1443_p1 = scmp.lt.u32.totalorder %s1439_s28, %s1843_s0 }
   0x5   :  { %p1445_p2 = pnand %p1443_p1, %p1440_p0 }
   0x7   :  { %1448 = shalt.err (!%p1445_p2)
}
   0x8   :  { %s1449_s10 = scalar_lea.vmem %s20_s25, 8192  ;;  %p1454_p4 = scmp.lt.s32.totalorder %s20_s25, %s20_s25 }
   0x9   :  { %p1450_p3 = scmp.ne.s32.totalorder %s20_s25, %s1449_s10  ;;  %p1455_p5 = scmp.lt.s32.totalorder %s1449_s10, %s1449_s10 }
   0xb   :  { %p1456_p6 = por %p1455_p5, %p1454_p4 }
   0xd   :  { %p1457_p7 = pnand %p1456_p6, %p1450_p3 }
   0xf   :  { %1460 = shalt.err (!%p1457_p7)
}
  0x10   :  { %s1488_s11 = smov 256   ;;  %s1489_s12 = smov 16  }
  0x11   :  { %25 = dma.hbm_to_vmem [thread:$0]  %s1843_s0, 8192, %s20_s25, [#allocation3], %s1488_s11, %s1488_s11, %s1489_s12  }
  0x12   :  { %1483 = dma.done.wait [#allocation3], 8192  }
  0x13   :  { %1484 = vsyncadd [#allocation3], 4294959104  ;;  %v1391_v0 = vld [vmem:[%s1844_s1 + $0x40] sm:$0xff]   ;;  %v1393_v2 = vld [vmem:[%s1844_s1 + $0x48] sm:$0xff]  }
  0x14   :  { %v1392_v1 = vld [vmem:[%s1844_s1] sm:$0xff]   ;;  %1186 = vmatprep.subr.bf16.mxu0 %v1391_v0  ;;  %v1394_v3 = vld [vmem:[%s1844_s1 + $0x8] sm:$0xff]   ;;  %v1395_v4 = vld [vmem:[%s1844_s1 + $0x50] sm:$0xff]  }
  0x15   :  { %1187 = vmatpush3.bf16.msra.mxu0 %v1392_v1  ;;  %v1396_v5 = vld [vmem:[%s1844_s1 + $0x10] sm:$0xff]   ;;  %v1397_v6 = vld [vmem:[%s1844_s1 + $0x58] sm:$0xff]   ;;  %v1399_v8 = vld [vmem:[%s1844_s1 + $0x60] sm:$0xff]  }
  0x16   :  { %1188 = vmatprep.subr.bf16.mxu0 %v1393_v2  ;;  %v1398_v7 = vld [vmem:[%s1844_s1 + $0x18] sm:$0xff]   ;;  %v1400_v9 = vld [vmem:[%s1844_s1 + $0x20] sm:$0xff]   ;;  %v1401_v10 = vld [vmem:[%s1844_s1 + $0x68] sm:$0xff]  }
  0x17   :  { %v43_v11 = vld [vmem:[#allocation2 + $0x8] sm:$0xff]  ;;  %v45_v12 = vld [vmem:[#allocation2 + $0x18] sm:$0xff]  ;;  %v1403_v15 = vld [vmem:[%s1844_s1 + $0x70] sm:$0xff]  }
  0x18   :  { %v107_v13 = vpack.c.bf16 %v45_v12, %v43_v11  ;;  %v1402_v14 = vld [vmem:[%s1844_s1 + $0x28] sm:$0xff]   ;;  %v1404_v16 = vld [vmem:[%s1844_s1 + $0x30] sm:$0xff]   ;;  %v1405_v17 = vld [vmem:[%s1844_s1 + $0x78] sm:$0xff]  }
  0x19   :  { %1189 = vmatpush3.bf16.msra.mxu0 %v1394_v3  ;;  %v1406_v18 = vld [vmem:[%s1844_s1 + $0x38] sm:$0xff]   ;;  %v42_v19 = vld [vmem:[#allocation2] sm:$0xff]  ;;  %v44_v20 = vld [vmem:[#allocation2 + $0x10] sm:$0xff] }
  0x1a   :  { %1190 = vmatprep.subr.bf16.mxu0 %v1395_v4  ;;  %305 = vmatprep.mubr.bf16.mxu0 %v107_v13  ;;  %v47_v21 = vld [vmem:[#allocation2 + $0x28] sm:$0xff]  ;;  %v49_v22 = vld [vmem:[#allocation2 + $0x38] sm:$0xff]  ;;  %v106_v23 = vpack.c.bf16 %v44_v20, %v42_v19  ;;  %v1407_v25 = vld [vmem:[%s1846_s3] sm:$0xff]  }
  0x1b   :  { %v109_v24 = vpack.c.bf16 %v49_v22, %v47_v21  ;;  %v46_v26 = vld [vmem:[#allocation2 + $0x20] sm:$0xff]  ;;  %v48_v27 = vld [vmem:[#allocation2 + $0x30] sm:$0xff]  ;;  %v51_v28 = vld [vmem:[#allocation2 + $0x48] sm:$0xff]  ;;  %1370 = vmatprep.subr.bf16.mxu1 %v1407_v25 }
  0x1c   :  { %v53_v29 = vld [vmem:[#allocation2 + $0x58] sm:$0xff]  ;;  %v1408_v30 = vld [vmem:[%s1846_s3 + $0x8] sm:$0xff]   ;;  %1378 = vmatpush3.bf16.msra.mxu1 %v1407_v25  ;;  %v108_v31 = vpack.c.bf16 %v48_v27, %v46_v26  ;;  %v1409_v33 = vld [vmem:[%s1846_s3 + $0x10] sm:$0xff]  }
  0x1d   :  { %1191 = vmatpush3.bf16.msra.mxu0 %v1396_v5  ;;  %v111_v32 = vpack.c.bf16 %v53_v29, %v51_v28  ;;  %1371 = vmatprep.subr.bf16.mxu1 %v1408_v30  ;;  %v50_v34 = vld [vmem:[#allocation2 + $0x40] sm:$0xff]  ;;  %v52_v35 = vld [vmem:[#allocation2 + $0x50] sm:$0xff]  ;;  %v55_v36 = vld [vmem:[#allocation2 + $0x68] sm:$0xff] }
  0x1e   :  { %1192 = vmatprep.subr.bf16.mxu0 %v1397_v6  ;;  %v1410_v37 = vld [vmem:[%s1846_s3 + $0x18] sm:$0xff]   ;;  %v1411_v39 = vld [vmem:[%s1846_s3 + $0x20] sm:$0xff]   ;;  %v110_v40 = vpack.c.bf16 %v52_v35, %v50_v34  ;;  %v1412_v42 = vld [vmem:[%s1846_s3 + $0x28] sm:$0xff]  }
  0x1f   :  { %v57_v38 = vld [vmem:[#allocation2 + $0x78] sm:$0xff]  ;;  %v54_v43 = vld [vmem:[#allocation2 + $0x60] sm:$0xff]  ;;  %v56_v44 = vld [vmem:[#allocation2 + $0x70] sm:$0xff] }
  0x20   :  { %1379 = vmatpush3.bf16.msra.mxu1 %v1408_v30  ;;  %v113_v41 = vpack.c.bf16 %v57_v38, %v55_v36  ;;  %v59_v45 = vld [vmem:[#allocation2 + $0x88] sm:$0xff]  ;;  %v61_v46 = vld [vmem:[#allocation2 + $0x98] sm:$0xff]  ;;  %v112_v47 = vpack.c.bf16 %v56_v44, %v54_v43  ;;  %v1413_v48 = vld [vmem:[%s1846_s3 + $0x30] sm:$0xff]  }
  0x21   :  { %1193 = vmatpush3.bf16.msra.mxu0 %v1398_v7  ;;  %1372 = vmatprep.subr.bf16.mxu1 %v1409_v33  ;;  %v115_v49 = vpack.c.bf16 %v61_v46, %v59_v45  ;;  %v58_v50 = vld [vmem:[#allocation2 + $0x80] sm:$0xff]  ;;  %v60_v51 = vld [vmem:[#allocation2 + $0x90] sm:$0xff]  ;;  %v63_v52 = vld [vmem:[#allocation2 + $0xa8] sm:$0xff] }
  0x22   :  { %1194 = vmatprep.subr.bf16.mxu0 %v1399_v8  ;;  %v65_v53 = vld [vmem:[#allocation2 + $0xb8] sm:$0xff]  ;;  %v114_v54 = vpack.c.bf16 %v60_v51, %v58_v50  ;;  %v62_v56 = vld [vmem:[#allocation2 + $0xa0] sm:$0xff]  ;;  %v64_v57 = vld [vmem:[#allocation2 + $0xb0] sm:$0xff] }
  0x23   :  { %v117_v55 = vpack.c.bf16 %v65_v53, %v63_v52  ;;  %v67_v58 = vld [vmem:[#allocation2 + $0xc8] sm:$0xff]  ;;  %v69_v59 = vld [vmem:[#allocation2 + $0xd8] sm:$0xff]  ;;  %v116_v60 = vpack.c.bf16 %v64_v57, %v62_v56  ;;  %v66_v62 = vld [vmem:[#allocation2 + $0xc0] sm:$0xff] }
  0x24   :  { %1380 = vmatpush3.bf16.msra.mxu1 %v1409_v33  ;;  %v119_v61 = vpack.c.bf16 %v69_v59, %v67_v58  ;;  %v68_v63 = vld [vmem:[#allocation2 + $0xd0] sm:$0xff]  ;;  %v71_v0 = vld [vmem:[#allocation2 + $0xe8] sm:$0xff]  ;;  %v73_v1 = vld [vmem:[#allocation2 + $0xf8] sm:$0xff] }
  0x25   :  { %1195 = vmatpush3.bf16.msra.mxu0 %v1400_v9  ;;  %1373 = vmatprep.subr.bf16.mxu1 %v1410_v37  ;;  %v118_v2 = vpack.c.bf16 %v68_v63, %v66_v62  ;;  %v121_v3 = vpack.c.bf16 %v73_v1, %v71_v0  ;;  %v70_v4 = vld [vmem:[#allocation2 + $0xe0] sm:$0xff]  ;;  %v72_v5 = vld [vmem:[#allocation2 + $0xf0] sm:$0xff]  ;;  %v75_v6 = vld [vmem:[#allocation2 + $0x108] sm:$0xff] }
  0x26   :  { %1196 = vmatprep.subr.bf16.mxu0 %v1401_v10  ;;  %v77_v7 = vld [vmem:[#allocation2 + $0x118] sm:$0xff]  ;;  %v120_v8 = vpack.c.bf16 %v72_v5, %v70_v4  ;;  %v74_v10 = vld [vmem:[#allocation2 + $0x100] sm:$0xff]  ;;  %v76_v11 = vld [vmem:[#allocation2 + $0x110] sm:$0xff] }
  0x27   :  { %v123_v9 = vpack.c.bf16 %v77_v7, %v75_v6  ;;  %v79_v12 = vld [vmem:[#allocation2 + $0x128] sm:$0xff]  ;;  %v81_v13 = vld [vmem:[#allocation2 + $0x138] sm:$0xff]  ;;  %v82_v22 = vld [vmem:[#allocation2 + $0x140] sm:$0xff] }
  0x28   :  { %1381 = vmatpush3.bf16.msra.mxu1 %v1410_v37  ;;  %v85_v19 = vld [vmem:[#allocation2 + $0x158] sm:$0xff]  ;;  %v86_v28 = vld [vmem:[#allocation2 + $0x160] sm:$0xff]  ;;  %v88_v29 = vld [vmem:[#allocation2 + $0x170] sm:$0xff] }
  0x29   :  { %1197 = vmatpush3.bf16.msra.mxu0 %v1402_v14  ;;  %1374 = vmatprep.subr.bf16.mxu1 %v1411_v39  ;;  %v122_v14 = vpack.c.bf16 %v76_v11, %v74_v10  ;;  %v90_v34 = vld [vmem:[#allocation2 + $0x180] sm:$0xff]  ;;  %v92_v35 = vld [vmem:[#allocation2 + $0x190] sm:$0xff]  ;;  %v95_v36 = vld [vmem:[#allocation2 + $0x1a8] sm:$0xff] }
  0x2a   :  { %1198 = vmatprep.subr.bf16.mxu0 %v1403_v15  ;;  %v125_v15 = vpack.c.bf16 %v81_v13, %v79_v12  ;;  %v1414_v38 = vld [vmem:[%s1846_s3 + $0x38] sm:$0xff]   ;;  %v99_v43 = vld [vmem:[#allocation2 + $0x1c8] sm:$0xff]  ;;  %v102_v53 = vld [vmem:[#allocation2 + $0x1e0] sm:$0xff] }
  0x2b   :  { %v101_v44 = vld [vmem:[#allocation2 + $0x1d8] sm:$0xff]  ;;  %v1622_v57 = vld [vmem:[%s1845_s2] ss:$0 sm:$0xff]  ;;  %v1417_v0 = vld [vmem:[%s1848_s5 + $0x4] ss:$8 sps:$4 sm:$0xff]  }
  0x2c   :  { %1382 = vmatpush3.bf16.msra.mxu1 %v1411_v39  ;;  %v135_v46 = vpack.c.bf16 %v101_v44, %v99_v43  ;;  %v105_v50 = vld [vmem:[#allocation2 + $0x1f8] sm:$0xff] }
  0x2d   :  { %1199 = vmatpush3.bf16.msra.mxu0 %v1404_v16  ;;  %1375 = vmatprep.subr.bf16.mxu1 %v1412_v42  ;;  %v78_v16 = vld [vmem:[#allocation2 + $0x120] sm:$0xff] }
  0x2e   :  { %1200 = vmatprep.subr.bf16.mxu0 %v1405_v17  ;;  %v80_v17 = vld [vmem:[#allocation2 + $0x130] sm:$0xff] }
  0x2f   :  { %v124_v20 = vpack.c.bf16 %v80_v17, %v78_v16 }
  0x30   :  { %1383 = vmatpush3.bf16.msra.mxu1 %v1412_v42 }
  0x31   :  { %1201 = vmatpush3.bf16.msra.mxu0 %v1406_v18  ;;  %1376 = vmatprep.subr.bf16.mxu1 %v1413_v48  ;;  %v83_v18 = vld [vmem:[#allocation2 + $0x148] sm:$0xff] }
  0x32   :  { %1322 = vmatprep.subr.bf16.mxu0 %v1407_v25  ;;  %v127_v21 = vpack.c.bf16 %v85_v19, %v83_v18 }
  0x34   :  { %306 = vmatmul.mubr.bf16.vlgmr.msra.gmra.mrb[0].mxu0 %v106_v23  ;;  %1384 = vmatpush3.bf16.msra.mxu1 %v1413_v48  ;;  %v84_v23 = vld [vmem:[#allocation2 + $0x150] sm:$0xff] }
  0x35   :  { %313 = vmatprep.mubr.bf16.mxu0 %v109_v24  ;;  %1323 = vmatpush3.bf16.msra.mxu0 %v1407_v25  ;;  %v87_v24 = vld [vmem:[#allocation2 + $0x168] sm:$0xff]  ;;  %v89_v25 = vld [vmem:[#allocation2 + $0x178] sm:$0xff]  ;;  %v126_v26 = vpack.c.bf16 %v84_v23, %v82_v22 }
  0x36   :  { %1324 = vmatprep.subr.bf16.mxu0 %v1408_v30  ;;  %v129_v27 = vpack.c.bf16 %v89_v25, %v87_v24  ;;  %1377 = vmatprep.subr.bf16.mxu1 %v1414_v38 }
  0x38   :  { %1385 = vmatpush3.bf16.msra.mxu1 %v1414_v38 }
  0x39   :  { %1325 = vmatpush3.bf16.msra.mxu0 %v1408_v30  ;;  %v91_v30 = vld [vmem:[#allocation2 + $0x188] sm:$0xff]  ;;  %870 = vmatprep.subr.bf16.mxu1 %v1417_v0 }
  0x3a   :  { %1326 = vmatprep.subr.bf16.mxu0 %v1409_v33 }
  0x3c   :  { %314 = vmatmul.mubr.bf16.gmra.mrb[4].mxu0 %v108_v31  ;;  %v93_v31 = vld [vmem:[#allocation2 + $0x198] sm:$0xff] }
  0x3d   :  { %321 = vmatprep.mubr.bf16.mxu0 %v111_v32  ;;  %1327 = vmatpush3.bf16.msra.mxu0 %v1409_v33  ;;  %v128_v32 = vpack.c.bf16 %v88_v29, %v86_v28  ;;  %v131_v33 = vpack.c.bf16 %v93_v31, %v91_v30 }
  0x3e   :  { %1328 = vmatprep.subr.bf16.mxu0 %v1410_v37 }
  0x41   :  { %1329 = vmatpush3.bf16.msra.mxu0 %v1410_v37  ;;  %v97_v37 = vld [vmem:[#allocation2 + $0x1b8] sm:$0xff] }
  0x42   :  { %1330 = vmatprep.subr.bf16.mxu0 %v1411_v39 }
  0x44   :  { %322 = vmatmul.mubr.bf16.gmra.mrb[8].mxu0 %v110_v40  ;;  %v133_v40 = vpack.c.bf16 %v97_v37, %v95_v36 }
  0x45   :  { %329 = vmatprep.mubr.bf16.mxu0 %v113_v41  ;;  %1331 = vmatpush3.bf16.msra.mxu0 %v1411_v39  ;;  %v130_v39 = vpack.c.bf16 %v92_v35, %v90_v34  ;;  %v94_v41 = vld [vmem:[#allocation2 + $0x1a0] sm:$0xff] }
  0x46   :  { %1332 = vmatprep.subr.bf16.mxu0 %v1412_v42 }
  0x49   :  { %1333 = vmatpush3.bf16.msra.mxu0 %v1412_v42  ;;  %v96_v42 = vld [vmem:[#allocation2 + $0x1b0] sm:$0xff] }
  0x4a   :  { %1334 = vmatprep.subr.bf16.mxu0 %v1413_v48  ;;  %v132_v45 = vpack.c.bf16 %v96_v42, %v94_v41 }
  0x4c   :  { %330 = vmatmul.mubr.bf16.gmra.mrb[12].mxu0 %v112_v47  ;;  %v98_v47 = vld [vmem:[#allocation2 + $0x1c0] sm:$0xff] }
  0x4d   :  { %337 = vmatprep.mubr.bf16.mxu0 %v115_v49  ;;  %1335 = vmatpush3.bf16.msra.mxu0 %v1413_v48  ;;  %v100_v48 = vld [vmem:[#allocation2 + $0x1d0] sm:$0xff]  ;;  %v103_v49 = vld [vmem:[#allocation2 + $0x1e8] sm:$0xff] }
  0x4e   :  { %1336 = vmatprep.subr.bf16.mxu0 %v1414_v38  ;;  %v134_v51 = vpack.c.bf16 %v100_v48, %v98_v47  ;;  %v137_v52 = vpack.c.bf16 %v105_v50, %v103_v49 }
  0x51   :  { %1337 = vmatpush3.bf16.msra.mxu0 %v1414_v38 }
  0x54   :  { %338 = vmatmul.mubr.bf16.gmra.mrb[16].mxu0 %v114_v54  ;;  %v104_v54 = vld [vmem:[#allocation2 + $0x1f0] sm:$0xff] }
  0x55   :  { %345 = vmatprep.mubr.bf16.mxu0 %v117_v55  ;;  %v136_v55 = vpack.c.bf16 %v104_v54, %v102_v53 }
  0x5c   :  { %346 = vmatmul.mubr.bf16.gmra.mrb[20].mxu0 %v116_v60 }
  0x5d   :  { %353 = vmatprep.mubr.bf16.mxu0 %v119_v61 }
  0x64   :  { %354 = vmatmul.mubr.bf16.gmra.mrb[24].mxu0 %v118_v2 }
  0x65   :  { %361 = vmatprep.mubr.bf16.mxu0 %v121_v3 }
  0x6c   :  { %362 = vmatmul.mubr.bf16.gmra.mrb[28].mxu0 %v120_v8 }
  0x6d   :  { %369 = vmatprep.mubr.bf16.mxu0 %v123_v9 }
  0x74   :  { %370 = vmatmul.mubr.bf16.gmra.mrb[32].mxu0 %v122_v14 }
  0x75   :  { %377 = vmatprep.mubr.bf16.mxu0 %v125_v15 }
  0x7c   :  { %378 = vmatmul.mubr.bf16.gmra.mrb[36].mxu0 %v124_v20 }
  0x7d   :  { %385 = vmatprep.mubr.bf16.mxu0 %v127_v21 }
  0x84   :  { %386 = vmatmul.mubr.bf16.gmra.mrb[40].mxu0 %v126_v26 }
  0x85   :  { %393 = vmatprep.mubr.bf16.mxu0 %v129_v27 }
  0x8c   :  { %394 = vmatmul.mubr.bf16.gmra.mrb[44].mxu0 %v128_v32 }
  0x8d   :  { %401 = vmatprep.mubr.bf16.mxu0 %v131_v33 }
  0x94   :  { %402 = vmatmul.mubr.bf16.gmra.mrb[48].mxu0 %v130_v39 }
  0x95   :  { %409 = vmatprep.mubr.bf16.mxu0 %v133_v40 }
  0x9c   :  { %410 = vmatmul.mubr.bf16.gmra.mrb[52].mxu0 %v132_v45 }
  0x9d   :  { %417 = vmatprep.mubr.bf16.mxu0 %v135_v46 }
  0xa4   :  { %418 = vmatmul.mubr.bf16.gmra.mrb[56].mxu0 %v134_v51 }
  0xa5   :  { %425 = vmatprep.mubr.bf16.mxu0 %v137_v52 }
  0xac   :  { %426 = vmatmul.mubr.bf16.gmra.mrb[60].mxu0 %v136_v55 }
 0x107   :  { %v1202_v56 = vpop.f32.mrb[0].mxu0 }
 0x108   :  { %v1203_v58 = vpop.f32.mrb[1].mxu0 }
 0x109   :  { %v1204_v59 = vadd.f32 %v1203_v58, %v1202_v56  ;;  %v1205_v60 = vpop.f32.mrb[2].mxu0 }
 0x10a   :  { %v1206_v61 = vpop.f32.mrb[3].mxu0 }
 0x10b   :  { %v308_v62 = vadd.f32 %v1204_v59, %v1622_v57  ;;  %v1207_v63 = vadd.f32 %v1206_v61, %v1205_v60 }
 0x10d   :  { %v311_v1 = vadd.f32 %v1207_v63, %v1622_v57  ;;  %v434_v2 = vmax.f32 %v308_v62, 0.0 }
 0x10f   :  { %v435_v3 = vmax.f32 %v311_v1, 0.0  ;;  %v1208_v4 = vpop.f32.mrb[4].mxu0 }
 0x110   :  { %v1209_v5 = vpop.f32.mrb[5].mxu0 }
 0x111   :  { %v1210_v6 = vadd.f32 %v1209_v5, %v1208_v4  ;;  %v1211_v7 = vpop.f32.mrb[6].mxu0  ;;  %v466_v8 = vpack.c.bf16 %v435_v3, %v434_v2 }
 0x112   :  { %v1212_v9 = vpop.f32.mrb[7].mxu0 }
 0x113   :  { %v316_v10 = vadd.f32 %v1210_v6, %v1622_v57  ;;  %v1213_v11 = vadd.f32 %v1212_v9, %v1211_v7  ;;  %1338 = vmatprep.mubr.bf16.mxu0 %v466_v8 }
 0x115   :  { %v319_v12 = vadd.f32 %v1213_v11, %v1622_v57  ;;  %v436_v13 = vmax.f32 %v316_v10, 0.0 }
 0x117   :  { %v437_v14 = vmax.f32 %v319_v12, 0.0  ;;  %v1214_v15 = vpop.f32.mrb[8].mxu0 }
 0x118   :  { %v1215_v16 = vpop.f32.mrb[9].mxu0 }
 0x119   :  { %v467_v17 = vpack.c.bf16 %v437_v14, %v436_v13  ;;  %v1216_v18 = vadd.f32 %v1215_v16, %v1214_v15  ;;  %v1217_v19 = vpop.f32.mrb[10].mxu0 }
 0x11a   :  { %v1218_v20 = vpop.f32.mrb[11].mxu0 }
 0x11b   :  { %v324_v21 = vadd.f32 %v1216_v18, %v1622_v57  ;;  %v1219_v22 = vadd.f32 %v1218_v20, %v1217_v19  ;;  %1339 = vmatmul.mubr.bf16.vlgmr.msra.gmra.mrb[64].mxu0 %v467_v17 }
 0x11d   :  { %v327_v23 = vadd.f32 %v1219_v22, %v1622_v57  ;;  %v438_v24 = vmax.f32 %v324_v21, 0.0 }
 0x11f   :  { %v439_v25 = vmax.f32 %v327_v23, 0.0  ;;  %v1220_v26 = vpop.f32.mrb[12].mxu0 }
 0x120   :  { %v1221_v27 = vpop.f32.mrb[13].mxu0 }
 0x121   :  { %v1222_v28 = vadd.f32 %v1221_v27, %v1220_v26  ;;  %v1223_v29 = vpop.f32.mrb[14].mxu0  ;;  %v468_v30 = vpack.c.bf16 %v439_v25, %v438_v24 }
 0x122   :  { %v1224_v31 = vpop.f32.mrb[15].mxu0 }
 0x123   :  { %v332_v32 = vadd.f32 %v1222_v28, %v1622_v57  ;;  %v1225_v33 = vadd.f32 %v1224_v31, %v1223_v29  ;;  %1342 = vmatprep.mubr.bf16.mxu0 %v468_v30 }
 0x125   :  { %v335_v34 = vadd.f32 %v1225_v33, %v1622_v57  ;;  %v440_v35 = vmax.f32 %v332_v32, 0.0 }
 0x127   :  { %v441_v36 = vmax.f32 %v335_v34, 0.0  ;;  %v1226_v37 = vpop.f32.mrb[16].mxu0 }
 0x128   :  { %v1227_v38 = vpop.f32.mrb[17].mxu0 }
 0x129   :  { %v1228_v39 = vadd.f32 %v1227_v38, %v1226_v37  ;;  %v1229_v40 = vpop.f32.mrb[18].mxu0  ;;  %v469_v41 = vpack.c.bf16 %v441_v36, %v440_v35 }
 0x12a   :  { %v1230_v42 = vpop.f32.mrb[19].mxu0 }
 0x12b   :  { %v340_v43 = vadd.f32 %v1228_v39, %v1622_v57  ;;  %v1231_v44 = vadd.f32 %v1230_v42, %v1229_v40  ;;  %1343 = vmatmul.mubr.bf16.gmra.mrb[68].mxu0 %v469_v41  ;;  %v1415_v42 = vld [vmem:[%s1848_s5] ss:$8 sps:$4 sm:$0xff]  }
 0x12d   :  { %v343_v45 = vadd.f32 %v1231_v44, %v1622_v57  ;;  %v442_v46 = vmax.f32 %v340_v43, 0.0 }
 0x12f   :  { %v443_v47 = vmax.f32 %v343_v45, 0.0  ;;  %v1232_v48 = vpop.f32.mrb[20].mxu0 }
 0x130   :  { %v1233_v49 = vpop.f32.mrb[21].mxu0 }
 0x131   :  { %v1234_v50 = vadd.f32 %v1233_v49, %v1232_v48  ;;  %v1235_v51 = vpop.f32.mrb[22].mxu0  ;;  %v470_v52 = vpack.c.bf16 %v443_v47, %v442_v46  ;;  %v1420_v46 = vld [vmem:[%s1848_s5 + $0x14] ss:$8 sps:$4 sm:$0xff]  }
 0x132   :  { %v1236_v53 = vpop.f32.mrb[23].mxu0 }
 0x133   :  { %v348_v54 = vadd.f32 %v1234_v50, %v1622_v57  ;;  %v1237_v55 = vadd.f32 %v1236_v53, %v1235_v51  ;;  %1346 = vmatprep.mubr.bf16.mxu0 %v470_v52  ;;  %v1418_v50 = vld [vmem:[%s1848_s5 + $0x10] ss:$8 sps:$4 sm:$0xff]   ;;  %v1423_v52 = vld [vmem:[%s1848_s5 + $0x24] ss:$8 sps:$4 sm:$0xff]  }
 0x135   :  { %v351_v56 = vadd.f32 %v1237_v55, %v1622_v57  ;;  %v444_v58 = vmax.f32 %v348_v54, 0.0 }
 0x137   :  { %v445_v59 = vmax.f32 %v351_v56, 0.0  ;;  %v1238_v60 = vpop.f32.mrb[24].mxu0 }
 0x138   :  { %v1239_v61 = vpop.f32.mrb[25].mxu0 }
 0x139   :  { %v1240_v62 = vadd.f32 %v1239_v61, %v1238_v60  ;;  %v1241_v63 = vpop.f32.mrb[26].mxu0  ;;  %v471_v0 = vpack.c.bf16 %v445_v59, %v444_v58  ;;  %v1421_v58 = vld [vmem:[%s1848_s5 + $0x20] ss:$8 sps:$4 sm:$0xff]  }
 0x13a   :  { %v1242_v1 = vpop.f32.mrb[27].mxu0 }
 0x13b   :  { %v356_v2 = vadd.f32 %v1240_v62, %v1622_v57  ;;  %v1243_v3 = vadd.f32 %v1242_v1, %v1241_v63  ;;  %1347 = vmatmul.mubr.bf16.gmra.mrb[72].mxu0 %v471_v0  ;;  %v1426_v62 = vld [vmem:[%s1848_s5 + $0x34] ss:$8 sps:$4 sm:$0xff]  }
 0x13d   :  { %v359_v4 = vadd.f32 %v1243_v3, %v1622_v57  ;;  %v446_v5 = vmax.f32 %v356_v2, 0.0  ;;  %v1424_v2 = vld [vmem:[%s1848_s5 + $0x30] ss:$8 sps:$4 sm:$0xff]  }
 0x13f   :  { %v447_v6 = vmax.f32 %v359_v4, 0.0  ;;  %v1244_v7 = vpop.f32.mrb[28].mxu0  ;;  %v1429_v4 = vld [vmem:[%s1848_s5 + $0x44] ss:$8 sps:$4 sm:$0xff]  }
 0x140   :  { %v1245_v8 = vpop.f32.mrb[29].mxu0 }
 0x141   :  { %v1246_v9 = vadd.f32 %v1245_v8, %v1244_v7  ;;  %v1247_v10 = vpop.f32.mrb[30].mxu0  ;;  %v472_v11 = vpack.c.bf16 %v447_v6, %v446_v5 }
 0x142   :  { %v1248_v12 = vpop.f32.mrb[31].mxu0 }
 0x143   :  { %v364_v13 = vadd.f32 %v1246_v9, %v1622_v57  ;;  %v1249_v14 = vadd.f32 %v1248_v12, %v1247_v10  ;;  %1350 = vmatprep.mubr.bf16.mxu0 %v472_v11  ;;  %v1427_v9 = vld [vmem:[%s1848_s5 + $0x40] ss:$8 sps:$4 sm:$0xff]  }
 0x145   :  { %v367_v15 = vadd.f32 %v1249_v14, %v1622_v57  ;;  %v448_v16 = vmax.f32 %v364_v13, 0.0  ;;  %v1432_v13 = vld [vmem:[%s1848_s5 + $0x54] ss:$8 sps:$4 sm:$0xff]  }
 0x147   :  { %v449_v17 = vmax.f32 %v367_v15, 0.0  ;;  %v1250_v18 = vpop.f32.mrb[32].mxu0 }
 0x148   :  { %v1251_v19 = vpop.f32.mrb[33].mxu0 }
 0x149   :  { %v1252_v20 = vadd.f32 %v1251_v19, %v1250_v18  ;;  %v1253_v21 = vpop.f32.mrb[34].mxu0  ;;  %v473_v22 = vpack.c.bf16 %v449_v17, %v448_v16  ;;  %v1430_v17 = vld [vmem:[%s1848_s5 + $0x50] ss:$8 sps:$4 sm:$0xff]   ;;  %v1435_v19 = vld [vmem:[%s1848_s5 + $0x64] ss:$8 sps:$4 sm:$0xff]  }
 0x14a   :  { %v1254_v23 = vpop.f32.mrb[35].mxu0 }
 0x14b   :  { %v1255_v24 = vadd.f32 %v1254_v23, %v1253_v21  ;;  %1351 = vmatmul.mubr.bf16.gmra.mrb[76].mxu0 %v473_v22  ;;  %v372_v25 = vadd.f32 %v1252_v20, %v1622_v57 }
 0x14d   :  { %v375_v26 = vadd.f32 %v1255_v24, %v1622_v57  ;;  %v450_v28 = vmax.f32 %v372_v25, 0.0  ;;  %v1433_v24 = vld [vmem:[%s1848_s5 + $0x60] ss:$8 sps:$4 sm:$0xff]  }
 0x14f   :  { %v1256_v27 = vpop.f32.mrb[36].mxu0  ;;  %v451_v29 = vmax.f32 %v375_v26, 0.0 }
 0x150   :  { %v1257_v30 = vpop.f32.mrb[37].mxu0 }
 0x151   :  { %v1258_v31 = vadd.f32 %v1257_v30, %v1256_v27  ;;  %v1259_v32 = vpop.f32.mrb[38].mxu0  ;;  %v474_v33 = vpack.c.bf16 %v451_v29, %v450_v28  ;;  %v1438_v29 = vld [vmem:[%s1848_s5 + $0x74] ss:$8 sps:$4 sm:$0xff]  }
 0x152   :  { %v1260_v34 = vpop.f32.mrb[39].mxu0 }
 0x153   :  { %v380_v35 = vadd.f32 %v1258_v31, %v1622_v57  ;;  %v1261_v36 = vadd.f32 %v1260_v34, %v1259_v32  ;;  %1354 = vmatprep.mubr.bf16.mxu1 %v474_v33  ;;  %v1436_v32 = vld [vmem:[%s1848_s5 + $0x70] ss:$8 sps:$4 sm:$0xff]  }
 0x155   :  { %v383_v37 = vadd.f32 %v1261_v36, %v1622_v57  ;;  %v452_v38 = vmax.f32 %v380_v35, 0.0 }
 0x157   :  { %v453_v39 = vmax.f32 %v383_v37, 0.0  ;;  %v1262_v40 = vpop.f32.mrb[40].mxu0 }
 0x158   :  { %v1263_v41 = vpop.f32.mrb[41].mxu0 }
 0x159   :  { %v1264_v43 = vadd.f32 %v1263_v41, %v1262_v40  ;;  %v1265_v44 = vpop.f32.mrb[42].mxu0  ;;  %v475_v45 = vpack.c.bf16 %v453_v39, %v452_v38 }
 0x15a   :  { %v1266_v47 = vpop.f32.mrb[43].mxu0 }
 0x15b   :  { %v388_v48 = vadd.f32 %v1264_v43, %v1622_v57  ;;  %v1267_v49 = vadd.f32 %v1266_v47, %v1265_v44  ;;  %1355 = vmatmul.mubr.bf16.vlgmr.msra.gmra.mrb[0].mxu1 %v475_v45 }
 0x15c   :  { %871 = vmatpush1.bf16.msra.mxu1 %v1415_v42 }
 0x15d   :  { %v391_v51 = vadd.f32 %v1267_v49, %v1622_v57  ;;  %872 = vmatprep.subr.bf16.mxu1 %v1420_v46  ;;  %v454_v53 = vmax.f32 %v388_v48, 0.0 }
 0x15f   :  { %v455_v54 = vmax.f32 %v391_v51, 0.0  ;;  %v1268_v55 = vpop.f32.mrb[44].mxu0 }
 0x160   :  { %v1269_v56 = vpop.f32.mrb[45].mxu0  ;;  %873 = vmatpush1.bf16.msra.mxu1 %v1418_v50 }
 0x161   :  { %v1270_v59 = vadd.f32 %v1269_v56, %v1268_v55  ;;  %v1271_v60 = vpop.f32.mrb[46].mxu0  ;;  %v476_v61 = vpack.c.bf16 %v455_v54, %v454_v53  ;;  %874 = vmatprep.subr.bf16.mxu1 %v1423_v52 }
 0x162   :  { %v1272_v63 = vpop.f32.mrb[47].mxu0 }
 0x163   :  { %v396_v0 = vadd.f32 %v1270_v59, %v1622_v57  ;;  %v1273_v1 = vadd.f32 %v1272_v63, %v1271_v60  ;;  %1358 = vmatprep.mubr.bf16.mxu1 %v476_v61  ;;  %v1490_v60 = vmov 0   ;;  %v1708_v61 = vld [vmem:[%s1847_s4] ss:$0 sm:$0xff] }
 0x164   :  { %875 = vmatpush1.bf16.msra.mxu1 %v1421_v58 }
 0x165   :  { %v399_v3 = vadd.f32 %v1273_v1, %v1622_v57  ;;  %876 = vmatprep.subr.bf16.mxu1 %v1426_v62  ;;  %v456_v5 = vmax.f32 %v396_v0, 0.0 }
 0x167   :  { %v457_v6 = vmax.f32 %v399_v3, 0.0  ;;  %v1274_v7 = vpop.f32.mrb[48].mxu0 }
 0x168   :  { %v1275_v8 = vpop.f32.mrb[49].mxu0  ;;  %877 = vmatpush1.bf16.msra.mxu1 %v1424_v2 }
 0x169   :  { %v1276_v10 = vadd.f32 %v1275_v8, %v1274_v7  ;;  %v1277_v11 = vpop.f32.mrb[50].mxu0  ;;  %v477_v12 = vpack.c.bf16 %v457_v6, %v456_v5  ;;  %878 = vmatprep.subr.bf16.mxu1 %v1429_v4 }
 0x16a   :  { %v1278_v14 = vpop.f32.mrb[51].mxu0 }
 0x16b   :  { %v404_v15 = vadd.f32 %v1276_v10, %v1622_v57  ;;  %v1279_v16 = vadd.f32 %v1278_v14, %v1277_v11  ;;  %1359 = vmatmul.mubr.bf16.gmra.mrb[4].mxu1 %v477_v12 }
 0x16c   :  { %879 = vmatpush1.bf16.msra.mxu1 %v1427_v9 }
 0x16d   :  { %v407_v18 = vadd.f32 %v1279_v16, %v1622_v57  ;;  %880 = vmatprep.subr.bf16.mxu1 %v1432_v13  ;;  %v458_v20 = vmax.f32 %v404_v15, 0.0 }
 0x16f   :  { %v459_v21 = vmax.f32 %v407_v18, 0.0  ;;  %v1280_v22 = vpop.f32.mrb[52].mxu0 }
 0x170   :  { %v1281_v23 = vpop.f32.mrb[53].mxu0  ;;  %881 = vmatpush1.bf16.msra.mxu1 %v1430_v17 }
 0x171   :  { %v1282_v25 = vadd.f32 %v1281_v23, %v1280_v22  ;;  %v1283_v26 = vpop.f32.mrb[54].mxu0  ;;  %v478_v27 = vpack.c.bf16 %v459_v21, %v458_v20  ;;  %882 = vmatprep.subr.bf16.mxu1 %v1435_v19 }
 0x172   :  { %v1284_v28 = vpop.f32.mrb[55].mxu0 }
 0x173   :  { %v412_v30 = vadd.f32 %v1282_v25, %v1622_v57  ;;  %v1285_v31 = vadd.f32 %v1284_v28, %v1283_v26  ;;  %1362 = vmatprep.mubr.bf16.mxu1 %v478_v27 }
 0x174   :  { %883 = vmatpush1.bf16.msra.mxu1 %v1433_v24 }
 0x175   :  { %v415_v33 = vadd.f32 %v1285_v31, %v1622_v57  ;;  %884 = vmatprep.subr.bf16.mxu1 %v1438_v29  ;;  %v460_v34 = vmax.f32 %v412_v30, 0.0 }
 0x177   :  { %v461_v35 = vmax.f32 %v415_v33, 0.0  ;;  %v1286_v36 = vpop.f32.mrb[56].mxu0 }
 0x178   :  { %v1287_v37 = vpop.f32.mrb[57].mxu0  ;;  %885 = vmatpush1.bf16.msra.mxu1 %v1436_v32 }
 0x179   :  { %v1288_v38 = vadd.f32 %v1287_v37, %v1286_v36  ;;  %v1289_v39 = vpop.f32.mrb[58].mxu0  ;;  %v479_v40 = vpack.c.bf16 %v461_v35, %v460_v34 }
 0x17a   :  { %v1290_v41 = vpop.f32.mrb[59].mxu0 }
 0x17b   :  { %v420_v42 = vadd.f32 %v1288_v38, %v1622_v57  ;;  %v1291_v43 = vadd.f32 %v1290_v41, %v1289_v39  ;;  %1363 = vmatmul.mubr.bf16.gmra.mrb[8].mxu1 %v479_v40 }
 0x17d   :  { %v423_v44 = vadd.f32 %v1291_v43, %v1622_v57  ;;  %v462_v45 = vmax.f32 %v420_v42, 0.0 }
 0x17f   :  { %v463_v46 = vmax.f32 %v423_v44, 0.0  ;;  %v1292_v47 = vpop.f32.mrb[60].mxu0 }
 0x180   :  { %v1293_v48 = vpop.f32.mrb[61].mxu0 }
 0x181   :  { %v1294_v49 = vadd.f32 %v1293_v48, %v1292_v47  ;;  %v1295_v50 = vpop.f32.mrb[62].mxu0  ;;  %v480_v51 = vpack.c.bf16 %v463_v46, %v462_v45 }
 0x182   :  { %v1296_v52 = vpop.f32.mrb[63].mxu0 }
 0x183   :  { %v428_v53 = vadd.f32 %v1294_v49, %v1622_v57  ;;  %v1297_v54 = vadd.f32 %v1296_v52, %v1295_v50  ;;  %1366 = vmatprep.mubr.bf16.mxu1 %v480_v51 }
 0x185   :  { %v431_v55 = vadd.f32 %v1297_v54, %v1622_v57  ;;  %v464_v56 = vmax.f32 %v428_v53, 0.0 }
 0x187   :  { %v465_v58 = vmax.f32 %v431_v55, 0.0 }
 0x189   :  { %v481_v59 = vpack.c.bf16 %v465_v58, %v464_v56 }
 0x18b   :  { %1367 = vmatmul.mubr.bf16.gmra.mrb[12].mxu1 %v481_v59 }
 0x18c   :  { %902 = vmatprep.mubr.bf16.mxu1 %v1490_v60 }
 0x1ee   :  { %v1340_v62 = vpop.f32.mrb[64].mxu0 }
 0x1ef   :  { %v596_v63 = vadd.f32 %v1340_v62, %v1708_v61  ;;  %v587_v0 = vpop.f32.mrb[65].mxu0 }
 0x1f0   :  { %v588_v1 = vadd.f32 %v1708_v61, %v587_v0  ;;  %v1341_v2 = vpop.f32.mrb[66].mxu0 }
 0x1f1   :  { %v599_v57 = vadd.f32 %v1341_v2, %v1708_v61  ;;  %v590_v3 = vpop.f32.mrb[67].mxu0  ;;  %v716_v5 = vmax.f32 %v596_v63, 0.0 }
 0x1f2   :  { %v591_v4 = vadd.f32 %v1708_v61, %v590_v3  ;;  %v714_v7 = vmax.f32 %v588_v1, 0.0 }
 0x1f3   :  { %v717_v6 = vmax.f32 %v599_v57, 0.0 }
 0x1f4   :  { %v715_v8 = vmax.f32 %v591_v4, 0.0 }
 0x1f5   :  { %v747_v9 = vpack.c.bf16 %v717_v6, %v716_v5 }
 0x1f6   :  { %v746_v10 = vpack.c.bf16 %v715_v8, %v714_v7 }
 0x1f8   :  { %903 = vmatmul.mubr.bf16.vlgmr.msra.gmra.mrb[16].mxu1 %v746_v10 }
 0x1f9   :  { %912 = vmatprep.mubr.bf16.mxu1 %v1490_v60 }
 0x1fe   :  { %v1344_v11 = vpop.f32.mrb[68].mxu0 }
 0x1ff   :  { %v612_v12 = vadd.f32 %v1344_v11, %v1708_v61  ;;  %v603_v13 = vpop.f32.mrb[69].mxu0 }
 0x200   :  { %v604_v14 = vadd.f32 %v1708_v61, %v603_v13  ;;  %v1345_v15 = vpop.f32.mrb[70].mxu0  ;;  %913 = vmatmul.mubr.bf16.gmra.mrb[20].mxu1 %v747_v9 }
 0x201   :  { %v615_v16 = vadd.f32 %v1345_v15, %v1708_v61  ;;  %v606_v17 = vpop.f32.mrb[71].mxu0  ;;  %922 = vmatprep.mubr.bf16.mxu1 %v1490_v60  ;;  %v720_v19 = vmax.f32 %v612_v12, 0.0 }
 0x202   :  { %v607_v18 = vadd.f32 %v1708_v61, %v606_v17  ;;  %v718_v21 = vmax.f32 %v604_v14, 0.0 }
 0x203   :  { %v721_v20 = vmax.f32 %v615_v16, 0.0 }
 0x204   :  { %v719_v22 = vmax.f32 %v607_v18, 0.0 }
 0x205   :  { %v749_v23 = vpack.c.bf16 %v721_v20, %v720_v19 }
 0x206   :  { %v748_v24 = vpack.c.bf16 %v719_v22, %v718_v21 }
 0x208   :  { %923 = vmatmul.mubr.bf16.gmra.mrb[24].mxu1 %v748_v24 }
 0x209   :  { %932 = vmatprep.mubr.bf16.mxu1 %v1490_v60 }
 0x20e   :  { %v1348_v25 = vpop.f32.mrb[72].mxu0 }
 0x20f   :  { %v628_v26 = vadd.f32 %v1348_v25, %v1708_v61  ;;  %v619_v27 = vpop.f32.mrb[73].mxu0 }
 0x210   :  { %v620_v28 = vadd.f32 %v1708_v61, %v619_v27  ;;  %v1349_v29 = vpop.f32.mrb[74].mxu0  ;;  %933 = vmatmul.mubr.bf16.gmra.mrb[28].mxu1 %v749_v23 }
 0x211   :  { %v631_v30 = vadd.f32 %v1349_v29, %v1708_v61  ;;  %v622_v31 = vpop.f32.mrb[75].mxu0  ;;  %942 = vmatprep.mubr.bf16.mxu1 %v1490_v60  ;;  %v724_v33 = vmax.f32 %v628_v26, 0.0 }
 0x212   :  { %v623_v32 = vadd.f32 %v1708_v61, %v622_v31  ;;  %v722_v35 = vmax.f32 %v620_v28, 0.0 }
 0x213   :  { %v725_v34 = vmax.f32 %v631_v30, 0.0 }
 0x214   :  { %v723_v36 = vmax.f32 %v623_v32, 0.0 }
 0x215   :  { %v751_v37 = vpack.c.bf16 %v725_v34, %v724_v33 }
 0x216   :  { %v750_v38 = vpack.c.bf16 %v723_v36, %v722_v35 }
 0x218   :  { %943 = vmatmul.mubr.bf16.gmra.mrb[32].mxu1 %v750_v38 }
 0x219   :  { %952 = vmatprep.mubr.bf16.mxu1 %v1490_v60 }
 0x21e   :  { %v1352_v39 = vpop.f32.mrb[76].mxu0 }
 0x21f   :  { %v644_v40 = vadd.f32 %v1352_v39, %v1708_v61  ;;  %v635_v41 = vpop.f32.mrb[77].mxu0 }
 0x220   :  { %v636_v42 = vadd.f32 %v1708_v61, %v635_v41  ;;  %v1353_v43 = vpop.f32.mrb[78].mxu0  ;;  %953 = vmatmul.mubr.bf16.gmra.mrb[36].mxu1 %v751_v37 }
 0x221   :  { %v647_v44 = vadd.f32 %v1353_v43, %v1708_v61  ;;  %v638_v45 = vpop.f32.mrb[79].mxu0  ;;  %962 = vmatprep.mubr.bf16.mxu1 %v1490_v60  ;;  %v728_v47 = vmax.f32 %v644_v40, 0.0 }
 0x222   :  { %v639_v46 = vadd.f32 %v1708_v61, %v638_v45  ;;  %v726_v49 = vmax.f32 %v636_v42, 0.0 }
 0x223   :  { %v729_v48 = vmax.f32 %v647_v44, 0.0 }
 0x224   :  { %v727_v50 = vmax.f32 %v639_v46, 0.0 }
 0x225   :  { %v753_v51 = vpack.c.bf16 %v729_v48, %v728_v47  ;;  %v780_v47 = vlaneseq }
 0x226   :  { %v752_v52 = vpack.c.bf16 %v727_v50, %v726_v49  ;;  %v778_v50 = vld [vmem:[%s1849_s6] sm:$0x3]  ;;  %s1491_s6 = smov [#allocation5]  }
 0x227   :  { %v781_v48 = vshrl.u32 %v780_v47, 7  ;;  %s1132_s1 = sshll.u32 %s1491_s6, 4  ;;  %s1133_s1 = int_to_ptr.vmem [resolvable:$true] %s1132_s1 }
 0x228   :  { %963 = vmatmul.mubr.bf16.gmra.mrb[40].mxu1 %v752_v52  ;;  %s1461_s26 = scalar_lea.vmem %s1133_s1, 8192  ;;  %p1466_p9 = scmp.lt.s32.totalorder %s1133_s1, %s1133_s1 }
 0x229   :  { %972 = vmatprep.mubr.bf16.mxu1 %v1490_v60  ;;  %v782_v49 = vsub.s32 0, %v781_v48  ;;  %p1462_p8 = scmp.ne.s32.totalorder %s1133_s1, %s1461_s26  ;;  %p1467_p10 = scmp.lt.s32.totalorder %s1461_s26, %s1461_s26 }
 0x22b   :  { %v1760_v52 = vrot.slane %v778_v50, %v782_v49  ;;  %p1468_p11 = por %p1467_p10, %p1466_p9 }
 0x22d   :  { %p1469_p12 = pnand %p1468_p11, %p1462_p8 }
 0x22e   :  { %v1356_v53 = vpop.f32.mrb[0].mxu1 }
 0x22f   :  { %v660_v54 = vadd.f32 %v1356_v53, %v1708_v61  ;;  %v651_v55 = vpop.f32.mrb[1].mxu1 }
 0x230   :  { %v652_v56 = vadd.f32 %v1708_v61, %v651_v55  ;;  %v1357_v58 = vpop.f32.mrb[2].mxu1  ;;  %973 = vmatmul.mubr.bf16.gmra.mrb[44].mxu1 %v753_v51  ;;  %v786_v51 = vsub.s32 1, %v781_v48 }
 0x231   :  { %v663_v59 = vadd.f32 %v1357_v58, %v1708_v61  ;;  %v654_v62 = vpop.f32.mrb[3].mxu1  ;;  %982 = vmatprep.mubr.bf16.mxu1 %v1490_v60  ;;  %v732_v0 = vmax.f32 %v660_v54, 0.0 }
 0x232   :  { %v655_v63 = vadd.f32 %v1708_v61, %v654_v62  ;;  %v730_v2 = vmax.f32 %v652_v56, 0.0 }
 0x233   :  { %v733_v1 = vmax.f32 %v663_v59, 0.0 }
 0x234   :  { %v731_v57 = vmax.f32 %v655_v63, 0.0 }
 0x235   :  { %v755_v3 = vpack.c.bf16 %v733_v1, %v732_v0 }
 0x236   :  { %v754_v4 = vpack.c.bf16 %v731_v57, %v730_v2 }
 0x238   :  { %983 = vmatmul.mubr.bf16.gmra.mrb[48].mxu1 %v754_v4 }
 0x239   :  { %992 = vmatprep.mubr.bf16.mxu1 %v1490_v60 }
 0x23e   :  { %v1360_v5 = vpop.f32.mrb[4].mxu1 }
 0x23f   :  { %v676_v6 = vadd.f32 %v1360_v5, %v1708_v61  ;;  %v667_v7 = vpop.f32.mrb[5].mxu1 }
 0x240   :  { %v668_v8 = vadd.f32 %v1708_v61, %v667_v7  ;;  %v1361_v9 = vpop.f32.mrb[6].mxu1  ;;  %993 = vmatmul.mubr.bf16.gmra.mrb[52].mxu1 %v755_v3 }
 0x241   :  { %v679_v10 = vadd.f32 %v1361_v9, %v1708_v61  ;;  %v670_v11 = vpop.f32.mrb[7].mxu1  ;;  %1002 = vmatprep.mubr.bf16.mxu1 %v1490_v60  ;;  %v736_v13 = vmax.f32 %v676_v6, 0.0 }
 0x242   :  { %v671_v12 = vadd.f32 %v1708_v61, %v670_v11  ;;  %v734_v15 = vmax.f32 %v668_v8, 0.0 }
 0x243   :  { %v737_v14 = vmax.f32 %v679_v10, 0.0 }
 0x244   :  { %v735_v16 = vmax.f32 %v671_v12, 0.0 }
 0x245   :  { %v757_v17 = vpack.c.bf16 %v737_v14, %v736_v13 }
 0x246   :  { %v756_v18 = vpack.c.bf16 %v735_v16, %v734_v15 }
 0x248   :  { %1003 = vmatmul.mubr.bf16.gmra.mrb[56].mxu1 %v756_v18 }
 0x249   :  { %1012 = vmatprep.mubr.bf16.mxu1 %v1490_v60 }
 0x24e   :  { %v1364_v19 = vpop.f32.mrb[8].mxu1 }
 0x24f   :  { %v692_v20 = vadd.f32 %v1364_v19, %v1708_v61  ;;  %v683_v21 = vpop.f32.mrb[9].mxu1 }
 0x250   :  { %v684_v22 = vadd.f32 %v1708_v61, %v683_v21  ;;  %v1365_v23 = vpop.f32.mrb[10].mxu1  ;;  %1013 = vmatmul.mubr.bf16.gmra.mrb[60].mxu1 %v757_v17 }
 0x251   :  { %v695_v24 = vadd.f32 %v1365_v23, %v1708_v61  ;;  %v686_v25 = vpop.f32.mrb[11].mxu1  ;;  %1022 = vmatprep.mubr.bf16.mxu1 %v1490_v60  ;;  %v740_v27 = vmax.f32 %v692_v20, 0.0 }
 0x252   :  { %v687_v26 = vadd.f32 %v1708_v61, %v686_v25  ;;  %v738_v29 = vmax.f32 %v684_v22, 0.0 }
 0x253   :  { %v741_v28 = vmax.f32 %v695_v24, 0.0 }
 0x254   :  { %v739_v30 = vmax.f32 %v687_v26, 0.0 }
 0x255   :  { %v759_v31 = vpack.c.bf16 %v741_v28, %v740_v27 }
 0x256   :  { %v758_v32 = vpack.c.bf16 %v739_v30, %v738_v29 }
 0x258   :  { %1023 = vmatmul.mubr.bf16.gmra.mrb[64].mxu1 %v758_v32 }
 0x259   :  { %1032 = vmatprep.mubr.bf16.mxu1 %v1490_v60 }
 0x25e   :  { %v1368_v33 = vpop.f32.mrb[12].mxu1 }
 0x25f   :  { %v708_v34 = vadd.f32 %v1368_v33, %v1708_v61  ;;  %v699_v35 = vpop.f32.mrb[13].mxu1 }
 0x260   :  { %v700_v36 = vadd.f32 %v1708_v61, %v699_v35  ;;  %v1369_v37 = vpop.f32.mrb[14].mxu1  ;;  %1033 = vmatmul.mubr.bf16.gmra.mrb[68].mxu1 %v759_v31 }
 0x261   :  { %v711_v38 = vadd.f32 %v1369_v37, %v1708_v61  ;;  %v702_v39 = vpop.f32.mrb[15].mxu1  ;;  %1042 = vmatprep.mubr.bf16.mxu1 %v1490_v60  ;;  %v744_v41 = vmax.f32 %v708_v34, 0.0 }
 0x262   :  { %v703_v40 = vadd.f32 %v1708_v61, %v702_v39  ;;  %v742_v43 = vmax.f32 %v700_v36, 0.0  ;;  %v1762_v61 = vrot.slane %v778_v50, %v786_v51 }
 0x263   :  { %v745_v42 = vmax.f32 %v711_v38, 0.0 }
 0x264   :  { %v743_v44 = vmax.f32 %v703_v40, 0.0 }
 0x265   :  { %v761_v45 = vpack.c.bf16 %v745_v42, %v744_v41 }
 0x266   :  { %v760_v46 = vpack.c.bf16 %v743_v44, %v742_v43 }
 0x268   :  { %1043 = vmatmul.mubr.bf16.gmra.mrb[72].mxu1 %v760_v46 }
 0x269   :  { %1052 = vmatprep.mubr.bf16.mxu1 %v1490_v60 }
 0x270   :  { %1053 = vmatmul.mubr.bf16.gmra.mrb[76].mxu1 %v761_v45 }
 0x2cb   :  { %v904_v53 = vpop.f32.mrb[16].mxu1 }
 0x2cc   :  { %v905_v54 = vadd.f32 %v904_v53, %v1760_v52  ;;  %v906_v55 = vpop.f32.mrb[17].mxu1 }
 0x2cd   :  { %v907_v56 = vadd.f32 %v906_v55, %v1762_v61  ;;  %v908_v60 = vpop.f32.mrb[18].mxu1 }
 0x2ce   :  { %1063 = vst [vmem:[#allocation5] sm:$0xff] %v905_v54  ;;  %v909_v58 = vadd.f32 %v908_v60, %v1760_v52  ;;  %v910_v59 = vpop.f32.mrb[19].mxu1 }
 0x2cf   :  { %1064 = vst [vmem:[#allocation5 + $0x8] sm:$0xff] %v907_v56  ;;  %v911_v62 = vadd.f32 %v910_v59, %v1762_v61 }
 0x2d0   :  { %1065 = vst [vmem:[#allocation5 + $0x10] sm:$0xff] %v909_v58 }
 0x2d1   :  { %1066 = vst [vmem:[#allocation5 + $0x18] sm:$0xff] %v911_v62 }
 0x2d3   :  { %v914_v63 = vpop.f32.mrb[20].mxu1 }
 0x2d4   :  { %v915_v0 = vadd.f32 %v914_v63, %v1760_v52  ;;  %v916_v1 = vpop.f32.mrb[21].mxu1 }
 0x2d5   :  { %v917_v2 = vadd.f32 %v916_v1, %v1762_v61  ;;  %v918_v57 = vpop.f32.mrb[22].mxu1 }
 0x2d6   :  { %1067 = vst [vmem:[#allocation5 + $0x20] sm:$0xff] %v915_v0  ;;  %v919_v3 = vadd.f32 %v918_v57, %v1760_v52  ;;  %v920_v4 = vpop.f32.mrb[23].mxu1 }
 0x2d7   :  { %1068 = vst [vmem:[#allocation5 + $0x28] sm:$0xff] %v917_v2  ;;  %v921_v5 = vadd.f32 %v920_v4, %v1762_v61 }
 0x2d8   :  { %1069 = vst [vmem:[#allocation5 + $0x30] sm:$0xff] %v919_v3 }
 0x2d9   :  { %1070 = vst [vmem:[#allocation5 + $0x38] sm:$0xff] %v921_v5 }
 0x2db   :  { %v924_v6 = vpop.f32.mrb[24].mxu1 }
 0x2dc   :  { %v925_v7 = vadd.f32 %v924_v6, %v1760_v52  ;;  %v926_v8 = vpop.f32.mrb[25].mxu1 }
 0x2dd   :  { %v927_v9 = vadd.f32 %v926_v8, %v1762_v61  ;;  %v928_v10 = vpop.f32.mrb[26].mxu1 }
 0x2de   :  { %1071 = vst [vmem:[#allocation5 + $0x40] sm:$0xff] %v925_v7  ;;  %v929_v11 = vadd.f32 %v928_v10, %v1760_v52  ;;  %v930_v12 = vpop.f32.mrb[27].mxu1 }
 0x2df   :  { %1072 = vst [vmem:[#allocation5 + $0x48] sm:$0xff] %v927_v9  ;;  %v931_v13 = vadd.f32 %v930_v12, %v1762_v61 }
 0x2e0   :  { %1073 = vst [vmem:[#allocation5 + $0x50] sm:$0xff] %v929_v11 }
 0x2e1   :  { %1074 = vst [vmem:[#allocation5 + $0x58] sm:$0xff] %v931_v13 }
 0x2e3   :  { %v934_v14 = vpop.f32.mrb[28].mxu1 }
 0x2e4   :  { %v935_v15 = vadd.f32 %v934_v14, %v1760_v52  ;;  %v936_v16 = vpop.f32.mrb[29].mxu1 }
 0x2e5   :  { %v937_v17 = vadd.f32 %v936_v16, %v1762_v61  ;;  %v938_v18 = vpop.f32.mrb[30].mxu1 }
 0x2e6   :  { %1075 = vst [vmem:[#allocation5 + $0x60] sm:$0xff] %v935_v15  ;;  %v939_v19 = vadd.f32 %v938_v18, %v1760_v52  ;;  %v940_v20 = vpop.f32.mrb[31].mxu1 }
 0x2e7   :  { %1076 = vst [vmem:[#allocation5 + $0x68] sm:$0xff] %v937_v17  ;;  %v941_v21 = vadd.f32 %v940_v20, %v1762_v61 }
 0x2e8   :  { %1077 = vst [vmem:[#allocation5 + $0x70] sm:$0xff] %v939_v19 }
 0x2e9   :  { %1078 = vst [vmem:[#allocation5 + $0x78] sm:$0xff] %v941_v21 }
 0x2eb   :  { %v944_v22 = vpop.f32.mrb[32].mxu1 }
 0x2ec   :  { %v945_v23 = vadd.f32 %v944_v22, %v1760_v52  ;;  %v946_v24 = vpop.f32.mrb[33].mxu1 }
 0x2ed   :  { %v947_v25 = vadd.f32 %v946_v24, %v1762_v61  ;;  %v948_v26 = vpop.f32.mrb[34].mxu1 }
 0x2ee   :  { %1079 = vst [vmem:[#allocation5 + $0x80] sm:$0xff] %v945_v23  ;;  %v949_v27 = vadd.f32 %v948_v26, %v1760_v52  ;;  %v950_v28 = vpop.f32.mrb[35].mxu1 }
 0x2ef   :  { %1080 = vst [vmem:[#allocation5 + $0x88] sm:$0xff] %v947_v25  ;;  %v951_v29 = vadd.f32 %v950_v28, %v1762_v61 }
 0x2f0   :  { %1081 = vst [vmem:[#allocation5 + $0x90] sm:$0xff] %v949_v27 }
 0x2f1   :  { %1082 = vst [vmem:[#allocation5 + $0x98] sm:$0xff] %v951_v29 }
 0x2f3   :  { %v954_v30 = vpop.f32.mrb[36].mxu1 }
 0x2f4   :  { %v955_v31 = vadd.f32 %v954_v30, %v1760_v52  ;;  %v956_v32 = vpop.f32.mrb[37].mxu1 }
 0x2f5   :  { %v957_v33 = vadd.f32 %v956_v32, %v1762_v61  ;;  %v958_v34 = vpop.f32.mrb[38].mxu1 }
 0x2f6   :  { %1083 = vst [vmem:[#allocation5 + $0xa0] sm:$0xff] %v955_v31  ;;  %v959_v35 = vadd.f32 %v958_v34, %v1760_v52  ;;  %v960_v36 = vpop.f32.mrb[39].mxu1 }
 0x2f7   :  { %1084 = vst [vmem:[#allocation5 + $0xa8] sm:$0xff] %v957_v33  ;;  %v961_v37 = vadd.f32 %v960_v36, %v1762_v61 }
 0x2f8   :  { %1085 = vst [vmem:[#allocation5 + $0xb0] sm:$0xff] %v959_v35 }
 0x2f9   :  { %1086 = vst [vmem:[#allocation5 + $0xb8] sm:$0xff] %v961_v37 }
 0x2fb   :  { %v964_v38 = vpop.f32.mrb[40].mxu1 }
 0x2fc   :  { %v965_v39 = vadd.f32 %v964_v38, %v1760_v52  ;;  %v966_v40 = vpop.f32.mrb[41].mxu1 }
 0x2fd   :  { %v967_v41 = vadd.f32 %v966_v40, %v1762_v61  ;;  %v968_v42 = vpop.f32.mrb[42].mxu1 }
 0x2fe   :  { %1087 = vst [vmem:[#allocation5 + $0xc0] sm:$0xff] %v965_v39  ;;  %v969_v43 = vadd.f32 %v968_v42, %v1760_v52  ;;  %v970_v44 = vpop.f32.mrb[43].mxu1 }
 0x2ff   :  { %1088 = vst [vmem:[#allocation5 + $0xc8] sm:$0xff] %v967_v41  ;;  %v971_v45 = vadd.f32 %v970_v44, %v1762_v61 }
 0x300   :  { %1089 = vst [vmem:[#allocation5 + $0xd0] sm:$0xff] %v969_v43 }
 0x301   :  { %1090 = vst [vmem:[#allocation5 + $0xd8] sm:$0xff] %v971_v45 }
 0x303   :  { %v974_v46 = vpop.f32.mrb[44].mxu1 }
 0x304   :  { %v975_v47 = vadd.f32 %v974_v46, %v1760_v52  ;;  %v976_v48 = vpop.f32.mrb[45].mxu1 }
 0x305   :  { %v977_v49 = vadd.f32 %v976_v48, %v1762_v61  ;;  %v978_v50 = vpop.f32.mrb[46].mxu1 }
 0x306   :  { %1091 = vst [vmem:[#allocation5 + $0xe0] sm:$0xff] %v975_v47  ;;  %v979_v51 = vadd.f32 %v978_v50, %v1760_v52  ;;  %v980_v53 = vpop.f32.mrb[47].mxu1 }
 0x307   :  { %1092 = vst [vmem:[#allocation5 + $0xe8] sm:$0xff] %v977_v49  ;;  %v981_v54 = vadd.f32 %v980_v53, %v1762_v61 }
 0x308   :  { %1093 = vst [vmem:[#allocation5 + $0xf0] sm:$0xff] %v979_v51 }
 0x309   :  { %1094 = vst [vmem:[#allocation5 + $0xf8] sm:$0xff] %v981_v54 }
 0x30b   :  { %v984_v55 = vpop.f32.mrb[48].mxu1 }
 0x30c   :  { %v985_v56 = vadd.f32 %v984_v55, %v1760_v52  ;;  %v986_v60 = vpop.f32.mrb[49].mxu1 }
 0x30d   :  { %v987_v58 = vadd.f32 %v986_v60, %v1762_v61  ;;  %v988_v59 = vpop.f32.mrb[50].mxu1 }
 0x30e   :  { %1095 = vst [vmem:[#allocation5 + $0x100] sm:$0xff] %v985_v56  ;;  %v989_v62 = vadd.f32 %v988_v59, %v1760_v52  ;;  %v990_v63 = vpop.f32.mrb[51].mxu1 }
 0x30f   :  { %1096 = vst [vmem:[#allocation5 + $0x108] sm:$0xff] %v987_v58  ;;  %v991_v0 = vadd.f32 %v990_v63, %v1762_v61 }
 0x310   :  { %1097 = vst [vmem:[#allocation5 + $0x110] sm:$0xff] %v989_v62 }
 0x311   :  { %1098 = vst [vmem:[#allocation5 + $0x118] sm:$0xff] %v991_v0 }
 0x313   :  { %v994_v1 = vpop.f32.mrb[52].mxu1 }
 0x314   :  { %v995_v2 = vadd.f32 %v994_v1, %v1760_v52  ;;  %v996_v57 = vpop.f32.mrb[53].mxu1 }
 0x315   :  { %v997_v3 = vadd.f32 %v996_v57, %v1762_v61  ;;  %v998_v4 = vpop.f32.mrb[54].mxu1 }
 0x316   :  { %1099 = vst [vmem:[#allocation5 + $0x120] sm:$0xff] %v995_v2  ;;  %v999_v5 = vadd.f32 %v998_v4, %v1760_v52  ;;  %v1000_v6 = vpop.f32.mrb[55].mxu1 }
 0x317   :  { %1100 = vst [vmem:[#allocation5 + $0x128] sm:$0xff] %v997_v3  ;;  %v1001_v7 = vadd.f32 %v1000_v6, %v1762_v61 }
 0x318   :  { %1101 = vst [vmem:[#allocation5 + $0x130] sm:$0xff] %v999_v5 }
 0x319   :  { %1102 = vst [vmem:[#allocation5 + $0x138] sm:$0xff] %v1001_v7 }
 0x31b   :  { %v1004_v8 = vpop.f32.mrb[56].mxu1 }
 0x31c   :  { %v1005_v9 = vadd.f32 %v1004_v8, %v1760_v52  ;;  %v1006_v10 = vpop.f32.mrb[57].mxu1 }
 0x31d   :  { %v1007_v11 = vadd.f32 %v1006_v10, %v1762_v61  ;;  %v1008_v12 = vpop.f32.mrb[58].mxu1 }
 0x31e   :  { %1103 = vst [vmem:[#allocation5 + $0x140] sm:$0xff] %v1005_v9  ;;  %v1009_v13 = vadd.f32 %v1008_v12, %v1760_v52  ;;  %v1010_v14 = vpop.f32.mrb[59].mxu1 }
 0x31f   :  { %1104 = vst [vmem:[#allocation5 + $0x148] sm:$0xff] %v1007_v11  ;;  %v1011_v15 = vadd.f32 %v1010_v14, %v1762_v61 }
 0x320   :  { %1105 = vst [vmem:[#allocation5 + $0x150] sm:$0xff] %v1009_v13 }
 0x321   :  { %1106 = vst [vmem:[#allocation5 + $0x158] sm:$0xff] %v1011_v15 }
 0x323   :  { %v1014_v16 = vpop.f32.mrb[60].mxu1 }
 0x324   :  { %v1015_v17 = vadd.f32 %v1014_v16, %v1760_v52  ;;  %v1016_v18 = vpop.f32.mrb[61].mxu1 }
 0x325   :  { %v1017_v19 = vadd.f32 %v1016_v18, %v1762_v61  ;;  %v1018_v20 = vpop.f32.mrb[62].mxu1 }
 0x326   :  { %1107 = vst [vmem:[#allocation5 + $0x160] sm:$0xff] %v1015_v17  ;;  %v1019_v21 = vadd.f32 %v1018_v20, %v1760_v52  ;;  %v1020_v22 = vpop.f32.mrb[63].mxu1 }
 0x327   :  { %1108 = vst [vmem:[#allocation5 + $0x168] sm:$0xff] %v1017_v19  ;;  %v1021_v23 = vadd.f32 %v1020_v22, %v1762_v61 }
 0x328   :  { %1109 = vst [vmem:[#allocation5 + $0x170] sm:$0xff] %v1019_v21 }
 0x329   :  { %1110 = vst [vmem:[#allocation5 + $0x178] sm:$0xff] %v1021_v23 }
 0x32b   :  { %v1024_v24 = vpop.f32.mrb[64].mxu1 }
 0x32c   :  { %v1025_v25 = vadd.f32 %v1024_v24, %v1760_v52  ;;  %v1026_v26 = vpop.f32.mrb[65].mxu1 }
 0x32d   :  { %v1027_v27 = vadd.f32 %v1026_v26, %v1762_v61  ;;  %v1028_v28 = vpop.f32.mrb[66].mxu1 }
 0x32e   :  { %1111 = vst [vmem:[#allocation5 + $0x180] sm:$0xff] %v1025_v25  ;;  %v1029_v29 = vadd.f32 %v1028_v28, %v1760_v52  ;;  %v1030_v30 = vpop.f32.mrb[67].mxu1 }
 0x32f   :  { %1112 = vst [vmem:[#allocation5 + $0x188] sm:$0xff] %v1027_v27  ;;  %v1031_v31 = vadd.f32 %v1030_v30, %v1762_v61 }
 0x330   :  { %1113 = vst [vmem:[#allocation5 + $0x190] sm:$0xff] %v1029_v29 }
 0x331   :  { %1114 = vst [vmem:[#allocation5 + $0x198] sm:$0xff] %v1031_v31 }
 0x333   :  { %v1034_v32 = vpop.f32.mrb[68].mxu1 }
 0x334   :  { %v1035_v33 = vadd.f32 %v1034_v32, %v1760_v52  ;;  %v1036_v34 = vpop.f32.mrb[69].mxu1 }
 0x335   :  { %v1037_v35 = vadd.f32 %v1036_v34, %v1762_v61  ;;  %v1038_v36 = vpop.f32.mrb[70].mxu1 }
 0x336   :  { %1115 = vst [vmem:[#allocation5 + $0x1a0] sm:$0xff] %v1035_v33  ;;  %v1039_v37 = vadd.f32 %v1038_v36, %v1760_v52  ;;  %v1040_v38 = vpop.f32.mrb[71].mxu1 }
 0x337   :  { %1116 = vst [vmem:[#allocation5 + $0x1a8] sm:$0xff] %v1037_v35  ;;  %v1041_v39 = vadd.f32 %v1040_v38, %v1762_v61 }
 0x338   :  { %1117 = vst [vmem:[#allocation5 + $0x1b0] sm:$0xff] %v1039_v37 }
 0x339   :  { %1118 = vst [vmem:[#allocation5 + $0x1b8] sm:$0xff] %v1041_v39 }
 0x33b   :  { %v1044_v40 = vpop.f32.mrb[72].mxu1 }
 0x33c   :  { %v1045_v41 = vadd.f32 %v1044_v40, %v1760_v52  ;;  %v1046_v42 = vpop.f32.mrb[73].mxu1 }
 0x33d   :  { %v1047_v43 = vadd.f32 %v1046_v42, %v1762_v61  ;;  %v1048_v44 = vpop.f32.mrb[74].mxu1 }
 0x33e   :  { %1119 = vst [vmem:[#allocation5 + $0x1c0] sm:$0xff] %v1045_v41  ;;  %v1049_v45 = vadd.f32 %v1048_v44, %v1760_v52  ;;  %v1050_v46 = vpop.f32.mrb[75].mxu1 }
 0x33f   :  { %1120 = vst [vmem:[#allocation5 + $0x1c8] sm:$0xff] %v1047_v43  ;;  %v1051_v47 = vadd.f32 %v1050_v46, %v1762_v61 }
 0x340   :  { %1121 = vst [vmem:[#allocation5 + $0x1d0] sm:$0xff] %v1049_v45 }
 0x341   :  { %1122 = vst [vmem:[#allocation5 + $0x1d8] sm:$0xff] %v1051_v47 }
 0x343   :  { %v1054_v48 = vpop.f32.mrb[76].mxu1 }
 0x344   :  { %v1055_v49 = vadd.f32 %v1054_v48, %v1760_v52  ;;  %v1056_v50 = vpop.f32.mrb[77].mxu1 }
 0x345   :  { %v1057_v51 = vadd.f32 %v1056_v50, %v1762_v61  ;;  %v1058_v53 = vpop.f32.mrb[78].mxu1 }
 0x346   :  { %1123 = vst [vmem:[#allocation5 + $0x1e0] sm:$0xff] %v1055_v49  ;;  %v1059_v54 = vadd.f32 %v1058_v53, %v1760_v52  ;;  %v1060_v55 = vpop.f32.mrb[79].mxu1 }
 0x347   :  { %1124 = vst [vmem:[#allocation5 + $0x1e8] sm:$0xff] %v1057_v51  ;;  %v1061_v56 = vadd.f32 %v1060_v55, %v1762_v61 }
 0x348   :  { %1125 = vst [vmem:[#allocation5 + $0x1f0] sm:$0xff] %v1059_v54 }
 0x349   :  { %1126 = vst [vmem:[#allocation5 + $0x1f8] sm:$0xff] %v1061_v56 }
 0x34a   :  { %1472 = shalt.err (!%p1469_p12)
}
 0x34b   :  { %s1473_s29 = scalar_lea.hbm %s1850_s7, 8192 }
 0x34c   :  { %p1474_p13 = scmp.ne.s32.totalorder %s1850_s7, %s1473_s29  ;;  %p1477_p0 = scmp.lt.u32.totalorder %s1473_s29, %s1850_s7 }
 0x34e   :  { %p1479_p1 = pnand %p1477_p0, %p1474_p13 }
 0x350   :  { %1482 = shalt.err (!%p1479_p1)
}
 0x351   :  { %1138 = dma.vmem_to_hbm [thread:$0]  %s1133_s1, 8192, %s1850_s7, [#allocation4], %s1488_s11, %s1488_s11, %s1489_s12  }
 0x352   :  { %1485 = dma.done.wait [#allocation4], 8192  }
 0x353   :  { %1486 = vsyncadd [#allocation4], 4294959104 }
 0x354   :  { %1142 = vsyncpa [#allocation3], 1 }
 0x355   :  { %1143 = vsyncpa [#allocation4], 1 }

</bundles_post_ra>
